<compile_context>
chip_gen: v7x
topology: tpu7x:2x2x1
jax: 0.10.0
libtpu: 0.0.40
codegen_flags: <defaults>
</compile_context>

<pallas_src>
import math
import functools

import jax
import jax.numpy as jnp
from jax.experimental import pallas as pl
from jax.experimental.pallas import tpu as pltpu


def _build_pe_table(max_len: int, d_model: int) -> jnp.ndarray:
    """Deterministic sinusoidal PE table, identical to the PyTorch __init__."""
    position = jnp.arange(0, max_len, dtype=jnp.float32)[:, None]            # (L, 1)
    div_term = jnp.exp(
        jnp.arange(0, d_model, 2, dtype=jnp.float32) * (-math.log(10000.0) / d_model)
    )                                                                         # (D/2,)
    pe = jnp.zeros((max_len, d_model), dtype=jnp.float32)
    pe = pe.at[:, 0::2].set(jnp.sin(position * div_term))
    pe = pe.at[:, 1::2].set(jnp.cos(position * div_term))
    return pe                                                                 # (L, D)


# ----------------------------- kernels --------------------------------------


def _pe_add_kernel(x_ref, pe_ref, o_ref):
    # x_ref/o_ref: (Bt, TR, 128); pe_ref: (TR, 128) shared table tile.
    o_ref[...] = (x_ref[...] + pe_ref[...][None, :, :]).astype(o_ref.dtype)


def _pe_add_dropout_kernel(x_ref, pe_ref, u_ref, o_ref, *, rate: float):
    # Inverted dropout: keep iff u >= rate, scale kept values by 1/(1-rate).
    y = x_ref[...] + pe_ref[...][None, :, :]                                  # (Bt, TR, 128)
    keep = u_ref[...] >= jnp.float32(rate)
    scale = jnp.asarray(1.0 / (1.0 - rate), dtype=y.dtype)
    o_ref[...] = jnp.where(keep, y * scale, jnp.zeros_like(y)).astype(o_ref.dtype)


# ----------------------------- wrapper ---------------------------------------


_LANES = 128


def _choose_layout(B: int, S: int, D: int, itemsize: int, target_bytes: int):
    """Lane-dense per-batch layout (R, 128) + row tile + batch-merge factor."""
    n = S * D
    n_pad = ((n + _LANES - 1) // _LANES) * _LANES
    R = n_pad // _LANES
    # Sublane pack for the dtype (rows per packed vreg group).
    pack = {4: 8, 2: 16, 1: 32}.get(itemsize, 8)
    bytes_per_row = _LANES * itemsize
    rows_target = max(pack, target_bytes // bytes_per_row)
    if R <= rows_target:
        tile_r = R                                   # whole per-batch slab in one tile
        per_batch_bytes = max(1, R * bytes_per_row)
        bt = min(B, max(1, int(target_bytes // per_batch_bytes)))
    else:
        tile_r = max(pack, (int(rows_target) // pack) * pack)
        bt = 1
    return n, n_pad, R, tile_r, bt


def positional_encoding(
    x: jnp.ndarray,
    pe_full: jnp.ndarray,
    *,
    dropout_rate: float = 0.1,
    training: bool = False,
    rng_key=None,
    target_bytes: int = 2 << 20,
) -> jnp.ndarray:
    """x: (B, S, D).  pe_full: (max_len, D) float32 sinusoidal table."""
    B, S, D = x.shape
    pe = pe_full[:S, :].astype(x.dtype)                                       # (S, D)

    use_dropout = training and dropout_rate > 0.0
    if use_dropout and dropout_rate >= 1.0:
        return jnp.zeros_like(x)

    itemsize = jnp.dtype(x.dtype).itemsize
    n, n_pad, R, tile_r, bt = _choose_layout(B, S, D, itemsize, target_bytes)
    pad = n_pad - n

    # Wrapper-side layout plumbing: flatten each batch, pad to a lane multiple.
    x_flat = x.reshape(B, n)
    pe_flat = pe.reshape(n)
    if pad:
        x_flat = jnp.pad(x_flat, ((0, 0), (0, pad)))
        pe_flat = jnp.pad(pe_flat, ((0, pad),))
    x2 = x_flat.reshape(B, R, _LANES)
    pe2 = pe_flat.reshape(R, _LANES)

    num_tiles = pl.cdiv(R, tile_r)
    num_bblocks = pl.cdiv(B, bt)
    x_block = (bt, tile_r, _LANES)
    pe_block = (tile_r, _LANES)
    out_shape = jax.ShapeDtypeStruct((B, R, _LANES), x.dtype)
    compiler_params = pltpu.CompilerParams(
        dimension_semantics=("parallel", "parallel"),
        vmem_limit_bytes=48 << 20,
    )

    if not use_dropout:
        # Eval-mode forward (dropout is identity, as in module.eval()).
        out2 = pl.pallas_call(
            _pe_add_kernel,
            out_shape=out_shape,
            grid_spec=pltpu.PrefetchScalarGridSpec(
                num_scalar_prefetch=0,
                grid=(num_tiles, num_bblocks),        # batch innermost -> pe tile resident
                in_specs=[
                    pl.BlockSpec(x_block, lambda t, bb: (bb, t, 0)),
                    pl.BlockSpec(pe_block, lambda t, bb: (t, 0)),
                ],
                out_specs=pl.BlockSpec(x_block, lambda t, bb: (bb, t, 0)),
            ),
            compiler_params=compiler_params,
        )(x2, pe2)
    else:
        # Training-mode forward: per-element uniform mask streamed to the kernel.
        if rng_key is None:
            rng_key = jax.random.PRNGKey(0)
        u = jax.random.uniform(rng_key, (B, R, _LANES), dtype=jnp.float32)
        kernel = functools.partial(_pe_add_dropout_kernel, rate=float(dropout_rate))
        out2 = pl.pallas_call(
            kernel,
            out_shape=out_shape,
            grid_spec=pltpu.PrefetchScalarGridSpec(
                num_scalar_prefetch=0,
                grid=(num_tiles, num_bblocks),
                in_specs=[
                    pl.BlockSpec(x_block, lambda t, bb: (bb, t, 0)),
                    pl.BlockSpec(pe_block, lambda t, bb: (t, 0)),
                    pl.BlockSpec(x_block, lambda t, bb: (bb, t, 0)),
                ],
                out_specs=pl.BlockSpec(x_block, lambda t, bb: (bb, t, 0)),
            ),
            compiler_params=compiler_params,
        )(x2, pe2, u)

    out_flat = out2.reshape(B, n_pad)
    if pad:
        out_flat = out_flat[:, :n]
    return out_flat.reshape(B, S, D)


# ----------------------------- main ------------------------------------------


if __name__ == "__main__":
    key = jax.random.PRNGKey(0)

    # Shapes consistent with the module: batch=2, seq=8, d_model=32.
    B, S, D = 2, 8, 32
    MAX_LEN = 64  # module default is 5000; only pe[:S] is used
    x = jax.random.normal(key, (B, S, D), dtype=jnp.float32)
    pe_full = _build_pe_table(MAX_LEN, D)
    ref = x + pe_full[None, :S, :]

    # --- eval path (deterministic; dropout is identity, as in module.eval()) ---
    out = positional_encoding(x, pe_full, dropout_rate=0.1, training=False)
    out = jax.block_until_ready(out)
    assert out.shape == (B, S, D) and out.dtype == jnp.float32
    assert jnp.allclose(out, ref, atol=1e-6, rtol=1e-6)

    # --- training path (stochastic inverted dropout) ---
    rate = 0.1
    out_tr = positional_encoding(
        x, pe_full, dropout_rate=rate, training=True, rng_key=jax.random.PRNGKey(123)
    )
    out_tr = jax.block_until_ready(out_tr)
    assert out_tr.shape == (B, S, D)
    kept_val = ref * jnp.float32(1.0 / (1.0 - rate))
    is_zero = jnp.abs(out_tr) < 1e-6
    is_kept = jnp.abs(out_tr - kept_val) <= 1e-4 * (1.0 + jnp.abs(kept_val))
    assert bool(jnp.all(is_zero | is_kept))
    assert float(jnp.mean(is_zero.astype(jnp.float32))) < 0.35

    # --- non-128-multiple feature dim: padded lane-dense path (S*D % 128 != 0) ---
    D2 = 40
    x2 = jax.random.normal(jax.random.PRNGKey(1), (B, S, D2), dtype=jnp.float32)
    pe_full2 = _build_pe_table(MAX_LEN, D2)
    out2 = positional_encoding(x2, pe_full2, dropout_rate=0.1, training=False)
    out2 = jax.block_until_ready(out2)
    assert jnp.allclose(out2, x2 + pe_full2[None, :S, :], atol=1e-6, rtol=1e-6)

    # --- row-tiled path (tile_r < R), forced via a tiny tile budget ---
    S3, D3 = 64, 128
    x3 = jax.random.normal(jax.random.PRNGKey(2), (B, S3, D3), dtype=jnp.float32)
    pe_full3 = _build_pe_table(S3, D3)
    out3 = positional_encoding(
        x3, pe_full3, dropout_rate=0.1, training=False, target_bytes=4096
    )
    out3 = jax.block_until_ready(out3)
    assert jnp.allclose(out3, x3 + pe_full3[None, :S3, :], atol=1e-6, rtol=1e-6)

    print("KERNEL_OK")
</pallas_src>

<mosaic_0001>
module attributes {stable_mosaic.version = 11 : i64} {
  func.func @_pe_add_kernel(%arg0: i32, %arg1: i32, %arg2: memref<2x2x128xf32, #tpu.memory_space<vmem>>, %arg3: memref<2x128xf32, #tpu.memory_space<vmem>>, %arg4: memref<2x2x128xf32, #tpu.memory_space<vmem>>) attributes {dimension_semantics = [#tpu.dimension_semantics<parallel>, #tpu.dimension_semantics<parallel>], iteration_bounds = array<i64: 1, 1>, scalar_prefetch = 0 : i64, scratch_operands = 0 : i64, tpu.core_type = #tpu.core_type<tc>, window_params = [{transform_indices = @transform_0, window_bounds = array<i64: 2, 2, 128>}, {transform_indices = @transform_1, window_bounds = array<i64: 2, 128>}, {transform_indices = @transform_2, window_bounds = array<i64: 2, 2, 128>}]} {
    %c0 = arith.constant 0 : index
    %c0_0 = arith.constant 0 : index
    %c0_1 = arith.constant 0 : index
    %0 = vector.load %arg2[%c0, %c0_0, %c0_1] : memref<2x2x128xf32, #tpu.memory_space<vmem>>, vector<2x2x128xf32>
    %c0_2 = arith.constant 0 : index
    %c0_3 = arith.constant 0 : index
    %1 = vector.load %arg3[%c0_2, %c0_3] : memref<2x128xf32, #tpu.memory_space<vmem>>, vector<2x128xf32>
    %2 = vector.shape_cast %1 : vector<2x128xf32> to vector<1x2x128xf32>
    %3 = vector.broadcast %2 : vector<1x2x128xf32> to vector<2x2x128xf32>
    %4 = arith.addf %0, %3 : vector<2x2x128xf32>
    %c0_4 = arith.constant 0 : index
    %c0_5 = arith.constant 0 : index
    %c0_6 = arith.constant 0 : index
    %5 = vector.load %arg4[%c0_4, %c0_5, %c0_6] : memref<2x2x128xf32, #tpu.memory_space<vmem>>, vector<2x2x128xf32>
    tpu.vector_store %arg4[%c0_4, %c0_5, %c0_6], %4 {strides = array<i32>} : memref<2x2x128xf32, #tpu.memory_space<vmem>>, vector<2x2x128xf32>,
    return
  }
  func.func @transform_0(%arg0: i32, %arg1: i32) -> (i32, i32, i32) {
    %c0_i32 = arith.constant 0 : i32
    %c0_i32_0 = arith.constant 0 : i32
    return %arg1, %arg0, %c0_i32 : i32, i32, i32
  }
  func.func @transform_1(%arg0: i32, %arg1: i32) -> (i32, i32) {
    %c0_i32 = arith.constant 0 : i32
    %c0_i32_0 = arith.constant 0 : i32
    return %arg0, %c0_i32 : i32, i32
  }
  func.func @transform_2(%arg0: i32, %arg1: i32) -> (i32, i32, i32) {
    %c0_i32 = arith.constant 0 : i32
    %c0_i32_0 = arith.constant 0 : i32
    return %arg1, %arg0, %c0_i32 : i32, i32, i32
  }
}

</mosaic_0001>

<bundles_post_ra>
// kernel: tpu_custom_call.1
= control target key start
LH: loop header
LB: loop body
LE: loop exit
PB: predicated region body
PF: predicated region fallthrough
CT: control target
= control target key end

     0   :  { %7 = vsyncpa [#allocation3], 0  ;;  %s154_s0 = inlined_call_operand.hbm [shape: f32[2,2,128], index: 0, kind: input, shape index: {}]   ;;  %s155_s1 = inlined_call_operand.vmem [shape: f32[2,128], index: 1, kind: input, shape index: {}]   ;;  %s156_s2 = inlined_call_operand.hbm [shape: f32[2,2,128], index: 2, kind: output, shape index: {}]  }
   0x1   :  { %8 = vsyncpa [#allocation4], 0  ;;  %s102_s9 = smov [#allocation2]   ;;  %s54_s13 = scalar_lea.hbm %s154_s0, 64 }
   0x2   :  { %s14_s10 = sshll.u32 %s102_s9, 4  ;;  %p55_p0 = scmp.ne.s32.totalorder %s154_s0, %s54_s13  ;;  %s15_s10 = int_to_ptr.vmem [resolvable:$true] %s14_s10 }
   0x3   :  { %p58_p1 = scmp.lt.u32.totalorder %s54_s13, %s154_s0 }
   0x5   :  { %p60_p2 = pnand %p58_p1, %p55_p0 }
   0x7   :  { %63 = shalt.err (!%p60_p2)
}
   0x8   :  { %s64_s18 = scalar_lea.vmem %s15_s10, 64  ;;  %p69_p4 = scmp.lt.s32.totalorder %s15_s10, %s15_s10 }
   0x9   :  { %p65_p3 = scmp.ne.s32.totalorder %s15_s10, %s64_s18  ;;  %p70_p5 = scmp.lt.s32.totalorder %s64_s18, %s64_s18 }
   0xb   :  { %p71_p6 = por %p70_p5, %p69_p4 }
   0xd   :  { %p72_p7 = pnand %p71_p6, %p65_p3 }
   0xf   :  { %75 = shalt.err (!%p72_p7)
}
  0x10   :  { %s103_s19 = smov 32   ;;  %s104_s20 = smov 2  }
  0x11   :  { %20 = dma.hbm_to_vmem [thread:$0]  %s154_s0, 64, %s15_s10, [#allocation3], %s103_s19, %s103_s19, %s104_s20  }
  0x12   :  { %98 = dma.done.wait [#allocation3], 64  }
  0x13   :  { %99 = vsyncadd [#allocation3], 4294967232  ;;  %s105_s23 = smov [#allocation5]   ;;  %v26_v0 = vld [vmem:[#allocation2] sm:$0x3] }
  0x14   :  { %s38_s24 = sshll.u32 %s105_s23, 4  ;;  %v28_v1 = vld [vmem:[%s155_s1] sm:$0x3]  ;;  %v27_v2 = vld [vmem:[#allocation2 + $0x2] sm:$0x3]  ;;  %s39_s24 = int_to_ptr.vmem [resolvable:$true] %s38_s24 }
  0x15   :  { %v29_v3 = vadd.f32 %v28_v1, %v26_v0  ;;  %v30_v4 = vadd.f32 %v28_v1, %v27_v2  ;;  %s76_s27 = scalar_lea.vmem %s39_s24, 64  ;;  %p81_p9 = scmp.lt.s32.totalorder %s39_s24, %s39_s24 }
  0x16   :  { %p77_p8 = scmp.ne.s32.totalorder %s39_s24, %s76_s27  ;;  %p82_p10 = scmp.lt.s32.totalorder %s76_s27, %s76_s27 }
  0x17   :  { %31 = vst [vmem:[#allocation5] sm:$0x3] %v29_v3  ;;  %32 = vst [vmem:[#allocation5 + $0x2] sm:$0x3] %v30_v4 }
  0x18   :  { %p83_p11 = por %p82_p10, %p81_p9 }
  0x1a   :  { %p84_p12 = pnand %p83_p11, %p77_p8 }
  0x1c   :  { %87 = shalt.err (!%p84_p12)
}
  0x1d   :  { %s88_s29 = scalar_lea.hbm %s156_s2, 64 }
  0x1e   :  { %p89_p13 = scmp.ne.s32.totalorder %s156_s2, %s88_s29  ;;  %p92_p0 = scmp.lt.u32.totalorder %s88_s29, %s156_s2 }
  0x20   :  { %p94_p1 = pnand %p92_p0, %p89_p13 }
  0x22   :  { %97 = shalt.err (!%p94_p1)
}
  0x23   :  { %44 = dma.vmem_to_hbm [thread:$0]  %s39_s24, 64, %s156_s2, [#allocation4], %s103_s19, %s103_s19, %s104_s20  }
  0x24   :  { %100 = dma.done.wait [#allocation4], 64  }
  0x25   :  { %101 = vsyncadd [#allocation4], 4294967232 }
  0x26   :  { %48 = vsyncpa [#allocation3], 1 }
  0x27   :  { %49 = vsyncpa [#allocation4], 1 }

</bundles_post_ra>
